<compile_context>
chip_gen: v6e
topology: v6e:2x2x1
jax: 0.10.0
libtpu: 0.0.40
codegen_flags: <defaults>
</compile_context>

<pallas_src>
import functools
import math

import jax
import jax.numpy as jnp
from jax.experimental import pallas as pl
from jax.experimental.pallas import tpu as pltpu


# --------------------------------------------------------------------------- kernel

def _fused_pointwise_kernel(x_ref, *refs, nb, n_out):
    # x_ref:    (nb, C, tp)   nb images, channels on sublanes, pixel tile on lanes
    # refs:     w_0..w_{n-1}  each (O_i, C)
    #           b_0..b_{n-1}  each (O_i, 1), f32
    #           o_0..o_{n-1}  each (nb, O_i, tp)
    w_refs = refs[:n_out]
    b_refs = refs[n_out:2 * n_out]
    out_refs = refs[2 * n_out:]
    for n in range(nb):                      # nb is small & static
        xn = x_ref[n]                        # (C, tp)
        for j in range(n_out):
            acc = jnp.dot(w_refs[j][...], xn,
                          preferred_element_type=jnp.float32)     # (O_j, tp)
            acc = acc + b_refs[j][...].astype(jnp.float32)        # lane broadcast
            out_refs[j][n] = acc.astype(out_refs[j].dtype)        # lane-dense store


# ----------------------------------------------------------------- tiling heuristics

def _vmem_capacity_bytes():
    try:
        return int(pltpu.get_tpu_info().vmem_capacity_bytes)
    except Exception:
        return 64 * 1024 * 1024  # conservative fallback (v7x per-core VMEM)


def _choose_tiling(batch, c, o_total, p_pad, *, in_itemsize, out_itemsize,
                   w_itemsize, budget):
    """Pick (images-per-step nb, pixel tile tp) fitting the VMEM budget.

    Accounts for double-buffered input/output blocks, the (constant-index) weight and
    bias blocks, and the f32 matmul accumulator.  Prefers the largest blocks; among
    fitting choices it prefers one that leaves >= 2 grid steps (megacore sharding) as
    long as the pixel tile stays large enough to hold the ~85%-of-roofline regime.
    """
    lanes = p_pad // 128
    tps = sorted({128 * d for d in range(1, lanes + 1) if lanes % d == 0},
                 reverse=True)
    capped = [t for t in tps if t <= 4096]   # bound the f32 acc / per-step DMA
    if capped:
        tps = capped
    nbs = [n for n in range(batch, 0, -1) if batch % n == 0]

    def step_bytes(nb, tp):
        in_b = 2 * nb * c * tp * in_itemsize            # double-buffered input blocks
        out_b = 2 * nb * o_total * tp * out_itemsize    # double-buffered output blocks
        w_b = 2 * o_total * c * w_itemsize              # weight blocks (constant index)
        b_b = 2 * o_total * 128 * 4                     # bias, lane-padded, f32
        acc_b = o_total * tp * 4                        # f32 accumulator(s)
        return in_b + out_b + w_b + b_b + acc_b

    best = None        # largest fitting block
    best_multi = None  # largest fitting block that still yields >= 2 grid steps
    for tp in tps:
        for nb in nbs:
            tot = step_bytes(nb, tp)
            if tot > budget:
                continue
            if best is None:
                best = (nb, tp, tot)
            if best_multi is None and (batch // nb) * (p_pad // tp) >= 2:
                best_multi = (nb, tp, tot)
        if best is not None and best_multi is not None:
            break

    if best is None:
        # Even the smallest block exceeds the budget; fall back and lean on
        # vmem_limit_bytes (only reachable for enormous C / O_total).
        nb, tp = 1, min(tps)
        return nb, tp, step_bytes(nb, tp)

    if best_multi is not None and (best_multi[1] >= 512 or best_multi[1] == best[1]):
        return best_multi
    return best


# --------------------------------------------------------------------------- wrapper

def fused_pointwise_proj(x, weights, biases, compute_dtype=None):
    """Fused 1x1-conv projections.

    x: (B, C, H, W); weights: tuple of (O_i, C); biases: tuple of (O_i,)
    returns: tuple of (B, O_i, H, W), one per weight, in x.dtype.
    compute_dtype: optional dtype (e.g. jnp.bfloat16) for x/weight streams; bias and
    accumulation stay f32.
    """
    B, C, H, W = x.shape
    P = H * W
    out_dtype = x.dtype
    cdt = jnp.dtype(compute_dtype) if compute_dtype is not None else jnp.dtype(x.dtype)

    x3 = x.reshape(B, C, P)                        # free reshape, no transpose
    if x3.dtype != cdt:
        x3 = x3.astype(cdt)
    # Pad pixels to a multiple of 128 so every store is an unmasked lane-dense vst.
    P_pad = ((P + 127) // 128) * 128
    if P_pad != P:
        x3 = jnp.pad(x3, ((0, 0), (0, 0), (0, P_pad - P)))

    ws = [w.astype(cdt) for w in weights]                       # (O_i, C)
    bs = [b.reshape(-1, 1).astype(jnp.float32) for b in biases]  # (O_i, 1), f32
    sizes = tuple(int(w.shape[0]) for w in weights)
    o_total = sum(sizes)
    n_out = len(weights)

    capacity = _vmem_capacity_bytes()
    budget = min(capacity // 2, 64 * 1024 * 1024)   # v7x ~32 MiB, v5e/v6e 64 MiB
    nb, tp, est = _choose_tiling(
        B, C, o_total, P_pad,
        in_itemsize=x3.dtype.itemsize,
        out_itemsize=jnp.dtype(out_dtype).itemsize,
        w_itemsize=jnp.dtype(cdt).itemsize,
        budget=budget)
    grid = (B // nb, P_pad // tp)
    vmem_limit = int(min(capacity - 8 * 1024 * 1024,
                         max(32 * 1024 * 1024, 2 * est)))

    kernel = functools.partial(_fused_pointwise_kernel, nb=nb, n_out=n_out)

    in_specs = [pl.BlockSpec((nb, C, tp), lambda i, p: (i, 0, p))]
    in_specs += [pl.BlockSpec((sz, C), lambda i, p: (0, 0)) for sz in sizes]
    in_specs += [pl.BlockSpec((sz, 1), lambda i, p: (0, 0)) for sz in sizes]
    out_specs = tuple(
        pl.BlockSpec((nb, sz, tp), lambda i, p: (i, 0, p)) for sz in sizes)

    flops = int(2 * B * P_pad * C * o_total)
    bytes_accessed = int(
        B * C * P_pad * x3.dtype.itemsize
        + o_total * C * jnp.dtype(cdt).itemsize
        + o_total * 4
        + B * o_total * P_pad * jnp.dtype(out_dtype).itemsize)

    outs = pl.pallas_call(
        kernel,
        out_shape=tuple(
            jax.ShapeDtypeStruct((B, sz, P_pad), out_dtype) for sz in sizes),
        grid_spec=pltpu.PrefetchScalarGridSpec(
            num_scalar_prefetch=0,
            grid=grid,
            in_specs=in_specs,
            out_specs=out_specs,
        ),
        compiler_params=pltpu.CompilerParams(
            dimension_semantics=("parallel", "parallel"),
            vmem_limit_bytes=vmem_limit,
        ),
        cost_estimate=pl.CostEstimate(
            flops=flops, transcendentals=0, bytes_accessed=bytes_accessed),
    )(x3, *ws, *bs)

    if P_pad != P:
        outs = tuple(o[:, :, :P] for o in outs)
    return tuple(o.reshape(B, sz, H, W) for o, sz in zip(outs, sizes))


# ---------------------------------------------------------------------------- module

class ConvProjectionNoReshapePallas:
    """JAX/Pallas port of ConvProjectionNoReshape (default kernel_size=1, stride=1)."""

    def __init__(self, dim, heads=8, dim_head=64, qk_frac=1.0, kernel_size=1,
                 q_stride=1, k_stride=1, v_stride=1, dropout=0.0, last_stage=False,
                 bias=True, compute_dtype=None, key=jax.random.PRNGKey(0)):
        if kernel_size != 1 or q_stride != 1 or k_stride != 1 or v_stride != 1:
            # TODO(synk): general odd kernel_size with reflect padding (lane-roll taps) not implemented.
            raise NotImplementedError(
                "Only the default kernel_size=1, stride=1 configuration is supported.")
        inner_dim = dim_head * heads
        inner_dim_qk = int(qk_frac * dim_head) * heads
        self.heads = heads
        self.dim = dim
        self.inner_dim = inner_dim
        self.inner_dim_qk = inner_dim_qk
        # bf16 on v6e/v7x halves HBM traffic of this memory-bound op; f32 acc preserved.
        self.compute_dtype = compute_dtype

        # nn.Conv2d-style init: uniform(-1/sqrt(fan_in), 1/sqrt(fan_in)).
        fan_in = dim * kernel_size * kernel_size
        bound = 1.0 / math.sqrt(fan_in)
        ks = jax.random.split(key, 6)

        def u(k, shape):
            return jax.random.uniform(k, shape, jnp.float32, -bound, bound)

        # Weights stored (O, C): the (O, C) x (C, P_tile) matmul keeps pixels on lanes.
        self.w_q = u(ks[0], (inner_dim_qk, dim))
        self.w_k = u(ks[1], (inner_dim_qk, dim))
        self.w_v = u(ks[2], (inner_dim, dim))
        if bias:
            self.b_q = u(ks[3], (inner_dim_qk,))
            self.b_k = u(ks[4], (inner_dim_qk,))
            self.b_v = u(ks[5], (inner_dim,))
        else:
            self.b_q = jnp.zeros((inner_dim_qk,), jnp.float32)
            self.b_k = jnp.zeros((inner_dim_qk,), jnp.float32)
            self.b_v = jnp.zeros((inner_dim,), jnp.float32)

    def __call__(self, x, attn_kv=None):
        # x: (B, C, H, W) -> (q, k, v), each (B, O_i, H, W), matching the PyTorch forward.
        cdt = self.compute_dtype
        if attn_kv is None:
            q, k, v = fused_pointwise_proj(
                x, (self.w_q, self.w_k, self.w_v), (self.b_q, self.b_k, self.b_v),
                compute_dtype=cdt)
        else:
            (q,) = fused_pointwise_proj(x, (self.w_q,), (self.b_q,), compute_dtype=cdt)
            k, v = fused_pointwise_proj(
                attn_kv, (self.w_k, self.w_v), (self.b_k, self.b_v), compute_dtype=cdt)
        return q, k, v


# --------------------------------------------------------------------------- testing

def _ref_proj(x, w, b):
    # Reference for a 1x1 conv (pointwise projection).
    y = jnp.einsum("oc,bchw->bohw", w, x, precision=jax.lax.Precision.HIGHEST)
    return y + b[None, :, None, None]


if __name__ == "__main__":
    key = jax.random.PRNGKey(0)
    k_x, k_kv, k_p = jax.random.split(key, 3)

    # Small shapes consistent with the module defaults (kernel_size=1, stride=1).
    B, dim, H, W = 2, 32, 16, 16
    heads, dim_head = 4, 8           # inner_dim = inner_dim_qk = 32
    x = jax.random.normal(k_x, (B, dim, H, W), dtype=jnp.float32)
    kv_in = jax.random.normal(k_kv, (B, dim, H, W), dtype=jnp.float32)

    module = ConvProjectionNoReshapePallas(dim, heads=heads, dim_head=dim_head, key=k_p)

    # Self-attention path (attn_kv = x).
    q, k, v = module(x)
    (q, k, v) = jax.block_until_ready((q, k, v))
    assert q.shape == (B, module.inner_dim_qk, H, W)
    assert k.shape == (B, module.inner_dim_qk, H, W)
    assert v.shape == (B, module.inner_dim, H, W)
    assert jnp.allclose(q, _ref_proj(x, module.w_q, module.b_q), atol=1e-2, rtol=1e-2)
    assert jnp.allclose(k, _ref_proj(x, module.w_k, module.b_k), atol=1e-2, rtol=1e-2)
    assert jnp.allclose(v, _ref_proj(x, module.w_v, module.b_v), atol=1e-2, rtol=1e-2)

    # Cross-attention path (explicit attn_kv).
    q2, k2, v2 = module(x, attn_kv=kv_in)
    (q2, k2, v2) = jax.block_until_ready((q2, k2, v2))
    assert jnp.allclose(q2, _ref_proj(x, module.w_q, module.b_q), atol=1e-2, rtol=1e-2)
    assert jnp.allclose(k2, _ref_proj(kv_in, module.w_k, module.b_k), atol=1e-2, rtol=1e-2)
    assert jnp.allclose(v2, _ref_proj(kv_in, module.w_v, module.b_v), atol=1e-2, rtol=1e-2)

    # Non-multiple-of-128 spatial size exercises the lane-padding path.
    H2, W2 = 10, 10
    x_odd = jax.random.normal(k_kv, (B, dim, H2, W2), dtype=jnp.float32)
    q3, k3, v3 = module(x_odd)
    (q3, k3, v3) = jax.block_until_ready((q3, k3, v3))
    assert q3.shape == (B, module.inner_dim_qk, H2, W2)
    assert jnp.allclose(q3, _ref_proj(x_odd, module.w_q, module.b_q), atol=1e-2, rtol=1e-2)
    assert jnp.allclose(v3, _ref_proj(x_odd, module.w_v, module.b_v), atol=1e-2, rtol=1e-2)

    # bf16 compute path (memory-bound perf mode on v6e/v7x): looser tolerance.
    module_bf16 = ConvProjectionNoReshapePallas(
        dim, heads=heads, dim_head=dim_head, compute_dtype=jnp.bfloat16, key=k_p)
    q4, k4, v4 = module_bf16(x)
    (q4, k4, v4) = jax.block_until_ready((q4, k4, v4))
    assert jnp.allclose(q4, _ref_proj(x, module.w_q, module.b_q), atol=5e-2, rtol=5e-2)
    assert jnp.allclose(v4, _ref_proj(x, module.w_v, module.b_v), atol=5e-2, rtol=5e-2)

    print("KERNEL_OK")
</pallas_src>

<mosaic_0001>
module attributes {stable_mosaic.version = 11 : i64} {
  func.func @_fused_pointwise_kernel(%arg0: i32, %arg1: i32, %arg2: memref<1x32x256xf32, #tpu.memory_space<vmem>>, %arg3: memref<32x32xf32, #tpu.memory_space<vmem>>, %arg4: memref<32x32xf32, #tpu.memory_space<vmem>>, %arg5: memref<32x32xf32, #tpu.memory_space<vmem>>, %arg6: memref<32x1xf32, #tpu.memory_space<vmem>>, %arg7: memref<32x1xf32, #tpu.memory_space<vmem>>, %arg8: memref<32x1xf32, #tpu.memory_space<vmem>>, %arg9: memref<1x32x256xf32, #tpu.memory_space<vmem>>, %arg10: memref<1x32x256xf32, #tpu.memory_space<vmem>>, %arg11: memref<1x32x256xf32, #tpu.memory_space<vmem>>) attributes {dimension_semantics = [#tpu.dimension_semantics<parallel>, #tpu.dimension_semantics<parallel>], iteration_bounds = array<i64: 2, 1>, scalar_prefetch = 0 : i64, scratch_operands = 0 : i64, tpu.core_type = #tpu.core_type<tc>, window_params = [{transform_indices = @transform_0, window_bounds = array<i64: 1, 32, 256>}, {pipeline_mode = #tpu.pipeline_mode<synchronous>, transform_indices = @transform_1, window_bounds = array<i64: 32, 32>}, {pipeline_mode = #tpu.pipeline_mode<synchronous>, transform_indices = @transform_2, window_bounds = array<i64: 32, 32>}, {pipeline_mode = #tpu.pipeline_mode<synchronous>, transform_indices = @transform_3, window_bounds = array<i64: 32, 32>}, {pipeline_mode = #tpu.pipeline_mode<synchronous>, transform_indices = @transform_4, window_bounds = array<i64: 32, 1>}, {pipeline_mode = #tpu.pipeline_mode<synchronous>, transform_indices = @transform_5, window_bounds = array<i64: 32, 1>}, {pipeline_mode = #tpu.pipeline_mode<synchronous>, transform_indices = @transform_6, window_bounds = array<i64: 32, 1>}, {transform_indices = @transform_7, window_bounds = array<i64: 1, 32, 256>}, {transform_indices = @transform_8, window_bounds = array<i64: 1, 32, 256>}, {transform_indices = @transform_9, window_bounds = array<i64: 1, 32, 256>}]} {
    %c0 = arith.constant 0 : index
    %c0_0 = arith.constant 0 : index
    %c0_1 = arith.constant 0 : index
    %0 = vector.load %arg2[%c0, %c0_0, %c0_1] : memref<1x32x256xf32, #tpu.memory_space<vmem>>, vector<1x32x256xf32>
    %1 = vector.shape_cast %0 : vector<1x32x256xf32> to vector<32x256xf32>
    %c0_2 = arith.constant 0 : index
    %c0_3 = arith.constant 0 : index
    %2 = vector.load %arg3[%c0_2, %c0_3] : memref<32x32xf32, #tpu.memory_space<vmem>>, vector<32x32xf32>
    %cst = arith.constant dense<0.000000e+00> : vector<32x256xf32>
    %3 = tpu.matmul %2, %1, %cst {dimension_numbers = #tpu.dot_dimension_numbers<[1], [0], [0], [1], [0, 0, 1, 1], [], []>} : vector<32x32xf32>, vector<32x256xf32>, vector<32x256xf32> -> vector<32x256xf32>
    %c0_4 = arith.constant 0 : index
    %c0_5 = arith.constant 0 : index
    %4 = vector.load %arg6[%c0_4, %c0_5] : memref<32x1xf32, #tpu.memory_space<vmem>>, vector<32x1xf32>
    %5 = vector.broadcast %4 : vector<32x1xf32> to vector<32x256xf32>
    %6 = arith.addf %3, %5 : vector<32x256xf32>
    %c0_6 = arith.constant 0 : index
    %c0_7 = arith.constant 0 : index
    %c0_8 = arith.constant 0 : index
    %7 = vector.load %arg9[%c0_6, %c0_7, %c0_8] : memref<1x32x256xf32, #tpu.memory_space<vmem>>, vector<1x32x256xf32>
    %8 = vector.shape_cast %7 : vector<1x32x256xf32> to vector<32x256xf32>
    %9 = vector.shape_cast %6 : vector<32x256xf32> to vector<1x32x256xf32>
    tpu.vector_store %arg9[%c0_6, %c0_7, %c0_8], %9 {strides = array<i32>} : memref<1x32x256xf32, #tpu.memory_space<vmem>>, vector<1x32x256xf32>,
    %c0_9 = arith.constant 0 : index
    %c0_10 = arith.constant 0 : index
    %10 = vector.load %arg4[%c0_9, %c0_10] : memref<32x32xf32, #tpu.memory_space<vmem>>, vector<32x32xf32>
    %cst_11 = arith.constant dense<0.000000e+00> : vector<32x256xf32>
    %11 = tpu.matmul %10, %1, %cst_11 {dimension_numbers = #tpu.dot_dimension_numbers<[1], [0], [0], [1], [0, 0, 1, 1], [], []>} : vector<32x32xf32>, vector<32x256xf32>, vector<32x256xf32> -> vector<32x256xf32>
    %c0_12 = arith.constant 0 : index
    %c0_13 = arith.constant 0 : index
    %12 = vector.load %arg7[%c0_12, %c0_13] : memref<32x1xf32, #tpu.memory_space<vmem>>, vector<32x1xf32>
    %13 = vector.broadcast %12 : vector<32x1xf32> to vector<32x256xf32>
    %14 = arith.addf %11, %13 : vector<32x256xf32>
    %c0_14 = arith.constant 0 : index
    %c0_15 = arith.constant 0 : index
    %c0_16 = arith.constant 0 : index
    %15 = vector.load %arg10[%c0_14, %c0_15, %c0_16] : memref<1x32x256xf32, #tpu.memory_space<vmem>>, vector<1x32x256xf32>
    %16 = vector.shape_cast %15 : vector<1x32x256xf32> to vector<32x256xf32>
    %17 = vector.shape_cast %14 : vector<32x256xf32> to vector<1x32x256xf32>
    tpu.vector_store %arg10[%c0_14, %c0_15, %c0_16], %17 {strides = array<i32>} : memref<1x32x256xf32, #tpu.memory_space<vmem>>, vector<1x32x256xf32>,
    %c0_17 = arith.constant 0 : index
    %c0_18 = arith.constant 0 : index
    %18 = vector.load %arg5[%c0_17, %c0_18] : memref<32x32xf32, #tpu.memory_space<vmem>>, vector<32x32xf32>
    %cst_19 = arith.constant dense<0.000000e+00> : vector<32x256xf32>
    %19 = tpu.matmul %18, %1, %cst_19 {dimension_numbers = #tpu.dot_dimension_numbers<[1], [0], [0], [1], [0, 0, 1, 1], [], []>} : vector<32x32xf32>, vector<32x256xf32>, vector<32x256xf32> -> vector<32x256xf32>
    %c0_20 = arith.constant 0 : index
    %c0_21 = arith.constant 0 : index
    %20 = vector.load %arg8[%c0_20, %c0_21] : memref<32x1xf32, #tpu.memory_space<vmem>>, vector<32x1xf32>
    %21 = vector.broadcast %20 : vector<32x1xf32> to vector<32x256xf32>
    %22 = arith.addf %19, %21 : vector<32x256xf32>
    %c0_22 = arith.constant 0 : index
    %c0_23 = arith.constant 0 : index
    %c0_24 = arith.constant 0 : index
    %23 = vector.load %arg11[%c0_22, %c0_23, %c0_24] : memref<1x32x256xf32, #tpu.memory_space<vmem>>, vector<1x32x256xf32>
    %24 = vector.shape_cast %23 : vector<1x32x256xf32> to vector<32x256xf32>
    %25 = vector.shape_cast %22 : vector<32x256xf32> to vector<1x32x256xf32>
    tpu.vector_store %arg11[%c0_22, %c0_23, %c0_24], %25 {strides = array<i32>} : memref<1x32x256xf32, #tpu.memory_space<vmem>>, vector<1x32x256xf32>,
    return
  }
  func.func @transform_0(%arg0: i32, %arg1: i32) -> (i32, i32, i32) {
    %c0_i32 = arith.constant 0 : i32
    %c0_i32_0 = arith.constant 0 : i32
    return %arg0, %c0_i32, %arg1 : i32, i32, i32
  }
  func.func @transform_1(%arg0: i32, %arg1: i32) -> (i32, i32) {
    %c0_i32 = arith.constant 0 : i32
    %c0_i32_0 = arith.constant 0 : i32
    %c0_i32_1 = arith.constant 0 : i32
    return %c0_i32, %c0_i32_0 : i32, i32
  }
  func.func @transform_2(%arg0: i32, %arg1: i32) -> (i32, i32) {
    %c0_i32 = arith.constant 0 : i32
    %c0_i32_0 = arith.constant 0 : i32
    %c0_i32_1 = arith.constant 0 : i32
    return %c0_i32, %c0_i32_0 : i32, i32
  }
  func.func @transform_3(%arg0: i32, %arg1: i32) -> (i32, i32) {
    %c0_i32 = arith.constant 0 : i32
    %c0_i32_0 = arith.constant 0 : i32
    %c0_i32_1 = arith.constant 0 : i32
    return %c0_i32, %c0_i32_0 : i32, i32
  }
  func.func @transform_4(%arg0: i32, %arg1: i32) -> (i32, i32) {
    %c0_i32 = arith.constant 0 : i32
    %c0_i32_0 = arith.constant 0 : i32
    %c0_i32_1 = arith.constant 0 : i32
    return %c0_i32, %c0_i32_0 : i32, i32
  }
  func.func @transform_5(%arg0: i32, %arg1: i32) -> (i32, i32) {
    %c0_i32 = arith.constant 0 : i32
    %c0_i32_0 = arith.constant 0 : i32
    %c0_i32_1 = arith.constant 0 : i32
    return %c0_i32, %c0_i32_0 : i32, i32
  }
  func.func @transform_6(%arg0: i32, %arg1: i32) -> (i32, i32) {
    %c0_i32 = arith.constant 0 : i32
    %c0_i32_0 = arith.constant 0 : i32
    %c0_i32_1 = arith.constant 0 : i32
    return %c0_i32, %c0_i32_0 : i32, i32
  }
  func.func @transform_7(%arg0: i32, %arg1: i32) -> (i32, i32, i32) {
    %c0_i32 = arith.constant 0 : i32
    %c0_i32_0 = arith.constant 0 : i32
    return %arg0, %c0_i32, %arg1 : i32, i32, i32
  }
  func.func @transform_8(%arg0: i32, %arg1: i32) -> (i32, i32, i32) {
    %c0_i32 = arith.constant 0 : i32
    %c0_i32_0 = arith.constant 0 : i32
    return %arg0, %c0_i32, %arg1 : i32, i32, i32
  }
  func.func @transform_9(%arg0: i32, %arg1: i32) -> (i32, i32, i32) {
    %c0_i32 = arith.constant 0 : i32
    %c0_i32_0 = arith.constant 0 : i32
    return %arg0, %c0_i32, %arg1 : i32, i32, i32
  }
}

</mosaic_0001>

<bundles_post_ra>
// kernel: tpu_custom_call.1
= control target key start
LH: loop header
LB: loop body
LE: loop exit
PB: predicated region body
PF: predicated region fallthrough
CT: control target
= control target key end

     0   :  { %15 = vsyncpa [#allocation3], 0  ;;  %s1751_s0 = inlined_call_operand.hbm [shape: f32[2,32,256], index: 0, kind: input, shape index: {}]   ;;  %s1752_s1 = inlined_call_operand.vmem [shape: f32[32,32], index: 1, kind: input, shape index: {}]   ;;  %s1753_s2 = inlined_call_operand.vmem [shape: f32[32,32], index: 2, kind: input, shape index: {}]   ;;  %s1754_s3 = inlined_call_operand.vmem [shape: f32[32,32], index: 3, kind: input, shape index: {}]   ;;  %s1755_s4 = inlined_call_operand.vmem [shape: f32[32,1], index: 4, kind: input, shape index: {}]   ;;  %s1756_s5 = inlined_call_operand.vmem [shape: f32[32,1], index: 5, kind: input, shape index: {}]   ;;  %s1757_s6 = inlined_call_operand.vmem [shape: f32[32,1], index: 6, kind: input, shape index: {}]   ;;  %s1758_s7 = inlined_call_operand.hbm [shape: f32[2,32,256], index: 7, kind: output, shape index: {0}]   ;;  %s1759_s8 = inlined_call_operand.hbm [shape: f32[2,32,256], index: 8, kind: output, shape index: {1}]   ;;  %s1760_s9 = inlined_call_operand.hbm [shape: f32[2,32,256], index: 9, kind: output, shape index: {2}]  }
   0x1   :  { %17 = vsyncpa [#allocation3 + $0x1], 0 }
   0x2   :  { %18 = vsyncpa [#allocation4], 0 }
   0x3   :  { %20 = vsyncpa [#allocation4 + $0x1], 0 }
   0x4   :  { %21 = vsyncpa [#allocation7], 0 }
   0x5   :  { %23 = vsyncpa [#allocation7 + $0x1], 0  ;;  %s1384_s30 = smov 0   ;;  %s1386_s10 = smov 0  }
   0x6   :  { %s1388_s11 = smov 0   ;;  %s1390_s12 = smov 0  }
   0x7   :  { %s1392_s13 = smov 0   ;;  %s1394_s14 = smov 0  }
   0x8 LB: > { %1767 = sst [smem:[#allocation12_spill]] %s1302_s30  ;;  %s1415_s15 = sadd.s32 4294967295, %s1322_s14   ;;  %s1322_s14 = sphi %s1394_s14, %s29_s14   ;;  %s1318_s13 = sphi %s1392_s13, %s1782_s13   ;;  %s1314_s12 = sphi %s1390_s12, %s1781_s12   ;;  %s1310_s11 = sphi %s1388_s11, %s1785_s11   ;;  %s1306_s10 = sphi %s1386_s10, %s1784_s10   ;;  %s1302_s30 = sphi %s1384_s30, %s1783_s30  }
   0x9   : > { %1768 = sst [smem:[#allocation13_spill]] %s1318_s13  ;;  %s1763_s16 = sadd.s32 4294967294, %s1322_s14  }
   0xa   : > { %s41_s17 = sadd.s32 1, %s1318_s13  ;;  %s50_s18 = sadd.s32 1, %s1310_s11 }
   0xb   : > { %p43_p0 = scmp.ge.s32.totalorder %s41_s17, 2  ;;  %p57_p1 = scmp.ne.s32.totalorder %s1310_s11, %s1306_s10 }
   0xc   : > { %p58_p2 = scmp.eq.s32.totalorder %s1322_s14, 0  ;;  %p63_p3 = scmp.ne.s32.totalorder %s1306_s10, %s1302_s30 }
   0xd   : > { %s1787_s17 = smov (%p43_p0, %s41_s17), 0  ;;  %p64_p5 = scmp.eq.s32.totalorder %s1415_s15, 0 }
   0xe   : > { %1769 = sst [smem:[#allocation14_spill]] %s1787_s17  ;;  %p1427_p4 = por %p58_p2, %p57_p1 }
   0xf   : > { %s45_s20 = ssub.s32 %s1318_s13, %s1787_s17  ;;  %p215_p6 = scmp.eq.s32.totalorder %s1415_s15, 1 }
  0x10   : > { %p48_p7 = scmp.eq.s32.totalorder %s45_s20, 0  ;;  %p1435_p8 = por %p64_p5, %p63_p3 }
  0x11   : > { %p1439_p9 = por %p215_p6, %p57_p1  ;;  %p221_p10 = scmp.eq.s32.totalorder %s1763_s16, 1 }
  0x12   : > { %s1446_s23 = scalar_select %p48_p7, %s1310_s11, %s50_s18  }
  0x13   : > { %p1448_p11 = por %p221_p10, %p63_p3  ;;  %p1100_p13 = scmp.lt.s32.totalorder %s1322_s14, 2 }
  0x14   : > { %1773 = sst [smem:[#allocation15_spill]] %s1446_s23  ;;  %s315_s25 = sand.u32 1, %s1310_s11  }
  0x15   : > { %s1035_s26 = sshll.u32 %s315_s25, 6  ;;  %s1066_s27 = sshll.u32 %s1318_s13, 10 }
  0x16   : > { %s327_s20 = scalar_lea.hbm %s1751_s0, %s1066_s27  ;;  %s319_s17 = scalar_lea.vmem [#allocation2], %s1035_s26 }
  0x17   : > { %s328_s30 = sshll.u32 %s319_s17, 4  ;;  %p1461_p0 = pnand %p1100_p13, %p1427_p4  ;;  %s329_s30 = int_to_ptr.vmem [resolvable:$true] %s328_s30 }
  0x18   : > { %p1038_p1 = scmp.ge.s32.totalorder %s1322_s14, 1  ;;  %s316_s16 = scalar_lea.sflag [#allocation3], %s315_s25 }
  0x19   : > { %p1160_p2 = pneg %p1461_p0  ;;  %s1171_s23 = scalar_lea.vmem %s329_s30, 1024 }
  0x1a   : > { %p1172_p3 = scmp.ne.s32.totalorder %s329_s30, %s1171_s23  ;;  %s1324_s13 = smov [#allocation2]  }
  0x1b   : > { %s1176_s28 = sshll.u32 %s1324_s13, 4  ;;  %s1177_s28 = int_to_ptr.vmem [resolvable:$false] %s1176_s28 }
  0x1c   : > { %p1174_p5 = pnand %p1172_p3, %p1160_p2  ;;  %s1178_s26 = scalar_lea.vmem %s1177_s28, 2048 }
  0x1d   : > { %p1179_p7 = scmp.lt.s32.totalorder %s329_s30, %s1177_s28  ;;  %p1180_p10 = scmp.lt.s32.totalorder %s1178_s26, %s1171_s23 }
  0x1e   : > { %p1175_p6 = pneg %p1174_p5 }
  0x1f   : > { %p1181_p12 = por %p1180_p10, %p1179_p7 }
  0x21   : > { %p1182_p4 = pnand %p1181_p12, %p1175_p6 }
  0x23   : > { %1185 = shalt.err (!%p1182_p4)
}
  0x24   : > { %s1325_s17 = smov 256   ;;  %s1326_s19 = smov 16  }
  0x25   : > { %1089 = dma.hbm_to_vmem [thread:$0]  (!%p1461_p0), %s327_s20, 1024, %s329_s30, %s316_s16, %s1325_s17, %s1325_s17, %s1326_s19  }
  0x26   : > { %p336_p13 = scmp.lt.s32.totalorder %s1322_s14, 3 }
  0x28   : > { %p337_p2 = pnand %p1038_p1, %p336_p13 }
  0x29   : > { %s1474_s13 = sand.u32 (!%p337_p2), 1, %s1306_s10  }
  0x2a   : > { %340 = sbr.rel (%p337_p2) target bundleno = 325 (0x145), region = 48  ;;  %s1477_s23 = sshll.u32 (!%p337_p2), %s1474_s13, 6 }
  0x2b   : > { %s343_s25 = scalar_lea.sflag (!%p337_p2), [#allocation3], %s1474_s13  ;;  %s346_s27 = scalar_lea.vmem (!%p337_p2), [#allocation2], %s1477_s23 }
  0x2f   : > { %1289 = dma.done.wait (%p1435_p8), %s343_s25, 1024  }
  0x30   : > { %1291 = vsyncadd (%p1435_p8), %s343_s25, 4294966272  ;;  %v1327_v0 = vmov 0.0   ;;  %v1328_v1 = vmov 0   ;;  %v402_v2 = vld [vmem:[%s346_s27 + $0x38] sm:$0xff]  ;;  %v401_v3 = vld [vmem:[%s346_s27 + $0x30] sm:$0xff]  ;;  %vm431_vm0 = vcmask 261120  }
  0x31   : > { %508 = vmatprep.mubr.f32.mxu0 %v1327_v0  ;;  %520 = vmatprep.mubr.f32.mxu1 %v1327_v0  ;;  %v400_v4 = vld [vmem:[%s346_s27 + $0x28] sm:$0xff]  ;;  %v399_v5 = vld [vmem:[%s346_s27 + $0x20] sm:$0xff]  ;;  %v398_v6 = vld [vmem:[%s346_s27 + $0x18] sm:$0xff]  ;;  %s376_s30 = scalar_lea.vmem [#allocation5], %s1477_s23  ;;  %s1591_s21 = sshll.u32 %s1314_s12, 10 }
  0x32   : > { %1157 = vset.pattern.permute.xlu1 %v1328_v1  ;;  %1156 = vset.pattern.permute.xlu0 %v1328_v1  ;;  %v397_v7 = vld [vmem:[%s346_s27 + $0x10] sm:$0xff]  ;;  %v396_v8 = vld [vmem:[%s346_s27 + $0x8] sm:$0xff]  ;;  %v395_v9 = vld [vmem:[%s346_s27] sm:$0xff]  ;;  %s841_s16 = sshll.u32 %s376_s30, 4  ;;  %s1599_s12 = scalar_lea.hbm %s1758_s7, %s1591_s21  ;;  %s1593_s16 = int_to_ptr.vmem [resolvable:$true] %s841_s16 }
  0x33   : > { %468 = vmatprep.subr.mxu0 %v402_v2  ;;  %1070 = vmatprep.subr.mxu1 %v402_v2  ;;  %v403_v10 = vld [vmem:[%s1752_s1] sm:$0xff]  ;;  %v405_v11 = vld [vmem:[%s1752_s1 + $0x10] sm:$0xff]  ;;  %v404_v12 = vld [vmem:[%s1752_s1 + $0x8] sm:$0xff]  ;;  %s816_s18 = scalar_lea.sflag [#allocation4], %s1474_s13  ;;  %s1186_s28 = scalar_lea.vmem %s1593_s16, 1024 }
  0x34   : > { %469 = vmatpush1.msra.mxu0 %v401_v3  ;;  %1074 = vmatpush1.msra.mxu1 %v401_v3  ;;  %v406_v13 = vld [vmem:[%s1752_s1 + $0x18] sm:$0xff]  ;;  %v541_v14 = vld [vmem:[%s1753_s2] sm:$0xff]  ;;  %v547_v16 = vld [vmem:[%s1756_s5 + $0x10] sm:$0xff]  ;;  %p1187_p8 = scmp.ne.s32.totalorder %s1593_s16, %s1186_s28  ;;  %s1329_s26 = smov [#allocation5]  }
  0x35   : > { %470 = vmatprep.subr.mxu0 %v400_v4  ;;  %1071 = vmatprep.subr.mxu1 %v400_v4  ;;  %v678_v15 = vld [vmem:[%s1754_s3] sm:$0xff]  ;;  %v542_v18 = vld [vmem:[%s1753_s2 + $0x8] sm:$0xff]  ;;  %v548_v20 = vld [vmem:[%s1756_s5 + $0x18] sm:$0xff]  ;;  %s1190_s17 = sshll.u32 %s1329_s26, 4  ;;  %s1191_s17 = int_to_ptr.vmem [resolvable:$false] %s1190_s17 }
  0x36   : > { %471 = vmatpush1.msra.mxu0 %v399_v5  ;;  %1075 = vmatpush1.msra.mxu1 %v399_v5  ;;  %v545_v17 = vld [vmem:[%s1756_s5] sm:$0xff]  ;;  %v679_v19 = vld [vmem:[%s1754_s3 + $0x8] sm:$0xff]  ;;  %v543_v22 = vld [vmem:[%s1753_s2 + $0x10] sm:$0xff]  ;;  %p1188_p12 = pnand %p1187_p8, %p1439_p9  ;;  %s1192_s19 = scalar_lea.vmem %s1191_s17, 2048 }
  0x37   : > { %472 = vmatprep.subr.mxu0 %v398_v6  ;;  %1072 = vmatprep.subr.mxu1 %v398_v6  ;;  %v546_v21 = vld [vmem:[%s1756_s5 + $0x8] sm:$0xff]  ;;  %v680_v23 = vld [vmem:[%s1754_s3 + $0x10] sm:$0xff]  ;;  %v407_v25 = vld [vmem:[%s1755_s4] sm:$0xff]  ;;  %p1193_p1 = scmp.lt.s32.totalorder %s1593_s16, %s1191_s17  ;;  %p1194_p3 = scmp.lt.s32.totalorder %s1192_s19, %s1186_s28 }
  0x38   : > { %473 = vmatpush1.msra.mxu0 %v397_v7  ;;  %1076 = vmatpush1.msra.mxu1 %v397_v7  ;;  %v408_v24 = vld [vmem:[%s1755_s4 + $0x8] sm:$0xff]  ;;  %v544_v26 = vld [vmem:[%s1753_s2 + $0x18] sm:$0xff]  ;;  %v409_v29 = vld [vmem:[%s1755_s4 + $0x10] sm:$0xff]  ;;  %p1189_p0 = pneg %p1188_p12 }
  0x39   : > { %474 = vmatprep.subr.mxu0 %v396_v8  ;;  %1073 = vmatprep.subr.mxu1 %v396_v8  ;;  %v681_v27 = vld [vmem:[%s1754_s3 + $0x18] sm:$0xff]  ;;  %v683_v30 = vld [vmem:[%s1757_s6 + $0x8] sm:$0xff]  ;;  %v682_v31 = vld [vmem:[%s1757_s6] sm:$0xff]  ;;  %p1195_p5 = por %p1194_p3, %p1193_p1 }
  0x3a   : > { %475 = vmatpush1.msra.mxu0 %v395_v9  ;;  %1077 = vmatpush1.msra.mxu1 %v395_v9  ;;  %v410_v28 = vld [vmem:[%s1755_s4 + $0x18] sm:$0xff]  ;;  %v684_v33 = vld [vmem:[%s1757_s6 + $0x10] sm:$0xff] }
  0x3b   : > { %1043 = vmatmul.mubr.msk.f32.vlgmr.msra.gmra.mxu0 %vm431_vm0, %v403_v10  ;;  %1045 = vmatmul.mubr.msk.f32.vlgmr.msra.gmra.mxu1 %vm431_vm0, %v405_v11  ;;  %v685_v32 = vld [vmem:[%s1757_s6 + $0x18] sm:$0xff]  ;;  %p1196_p6 = pnand %p1195_p5, %p1189_p0 }
  0x3c   : > { %605 = vmatprep.subr.mxu1 %v402_v2  ;;  %742 = vmatprep.subr.mxu0 %v402_v2 }
  0x3d   : > { %606 = vmatpush1.msra.mxu1 %v401_v3  ;;  %743 = vmatpush1.msra.mxu0 %v401_v3 }
  0x3e   : > { %607 = vmatprep.subr.mxu1 %v400_v4  ;;  %744 = vmatprep.subr.mxu0 %v400_v4 }
  0x3f   : > { %514 = vmatprep.mubr.f32.mxu0 %v1327_v0  ;;  %526 = vmatprep.mubr.f32.mxu1 %v1327_v0 }
  0x40   : > { %608 = vmatpush1.msra.mxu1 %v399_v5  ;;  %745 = vmatpush1.msra.mxu0 %v399_v5 }
  0x41   : > { %1044 = vmatmul.mubr.msk.f32.gmra.mxu0 %vm431_vm0, %v404_v12  ;;  %1046 = vmatmul.mubr.msk.f32.gmra.mxu1 %vm431_vm0, %v406_v13 }
  0x42   : > { %609 = vmatprep.subr.mxu1 %v398_v6  ;;  %746 = vmatprep.subr.mxu0 %v398_v6 }
  0x43   : > { %610 = vmatpush1.msra.mxu1 %v397_v7  ;;  %747 = vmatpush1.msra.mxu0 %v397_v7 }
  0x44   : > { %611 = vmatprep.subr.mxu1 %v396_v8  ;;  %748 = vmatprep.subr.mxu0 %v396_v8 }
  0x45   : > { %612 = vmatpush1.msra.mxu1 %v395_v9  ;;  %645 = vmatprep.mubr.f32.mxu1 %v1327_v0 }
  0x46   : > { %749 = vmatpush1.msra.mxu0 %v395_v9  ;;  %782 = vmatprep.mubr.f32.mxu0 %v1327_v0 }
  0x47   : > { %1047 = vmatmul.mubr.msk.f32.vlgmr.msra.gmra.mxu1 %vm431_vm0, %v541_v14  ;;  %1051 = vmatmul.mubr.msk.f32.vlgmr.msra.gmra.mxu0 %vm431_vm0, %v678_v15 }
  0x48   : > { %651 = vmatprep.mubr.f32.mxu1 %v1327_v0  ;;  %788 = vmatprep.mubr.f32.mxu0 %v1327_v0 }
  0x49   : > { %561 = vperm.xlu1 %1157, %v547_v16   ;;  %551 = vperm.xlu0 %1156, %v545_v17  }
  0x4b   : > { %1048 = vmatmul.mubr.msk.f32.gmra.mxu1 %vm431_vm0, %v542_v18  ;;  %1052 = vmatmul.mubr.msk.f32.gmra.mxu0 %vm431_vm0, %v679_v19 }
  0x4c   : > { %657 = vmatprep.mubr.f32.mxu1 %v1327_v0  ;;  %794 = vmatprep.mubr.f32.mxu0 %v1327_v0 }
  0x4d   : > { %566 = vperm.xlu1 %1157, %v548_v20   ;;  %556 = vperm.xlu0 %1156, %v546_v21  }
  0x4f   : > { %1049 = vmatmul.mubr.msk.f32.gmra.mxu1 %vm431_vm0, %v543_v22  ;;  %1053 = vmatmul.mubr.msk.f32.gmra.mxu0 %vm431_vm0, %v680_v23 }
  0x50   : > { %663 = vmatprep.mubr.f32.mxu1 %v1327_v0  ;;  %800 = vmatprep.mubr.f32.mxu0 %v1327_v0 }
  0x51   : > { %418 = vperm.xlu1 %1157, %v408_v24   ;;  %413 = vperm.xlu0 %1156, %v407_v25  }
  0x53   : > { %1050 = vmatmul.mubr.msk.f32.gmra.mxu1 %vm431_vm0, %v544_v26  ;;  %1054 = vmatmul.mubr.msk.f32.gmra.mxu0 %vm431_vm0, %v681_v27 }
  0x55   : > { %428 = vperm.xlu1 %1157, %v410_v28   ;;  %423 = vperm.xlu0 %1156, %v409_v29  }
  0x59   : > { %693 = vperm.xlu1 %1157, %v683_v30   ;;  %688 = vperm.xlu0 %1156, %v682_v31  }
  0x5d   : > { %703 = vperm.xlu1 %1157, %v685_v32   ;;  %698 = vperm.xlu0 %1156, %v684_v33  }
  0xc4   : > { %v1581_v34 = vpop.permute.xlu0 %551  ;;  %v1583_v35 = vpop.permute.xlu1 %561 }
  0xc8   : > { %v1585_v36 = vpop.permute.xlu0 %556  ;;  %v1587_v37 = vpop.permute.xlu1 %566 }
  0xcc   : > { %v414_v38 = vpop.permute.xlu0 %413  ;;  %v419_v39 = vpop.permute.xlu1 %418 }
  0xd0   : > { %v424_v40 = vpop.permute.xlu0 %423  ;;  %v429_v49 = vpop.permute.xlu1 %428 }
  0xd4   : > { %v689_v58 = vpop.permute.xlu0 %688 }
  0xfb   : > { %v510_v41 = vpop.f32.mrf.mxu0  ;;  %v522_v42 = vpop.f32.mrf.mxu1 }
  0xfc   : > { %v511_v43 = vadd.f32 %v510_v41, %v414_v38  ;;  %v523_v44 = vadd.f32 %v522_v42, %v424_v40 }
  0xfd   : > { %v512_v45 = vpop.f32.mrf.mxu0  ;;  %v524_v46 = vpop.f32.mrf.mxu1 }
  0xfe   : > { %533 = vst [vmem:[%s376_s30] sm:$0xff] %v511_v43  ;;  %537 = vst [vmem:[%s376_s30 + $0x20] sm:$0xff] %v523_v44  ;;  %v513_v47 = vadd.f32 %v512_v45, %v414_v38  ;;  %v525_v48 = vadd.f32 %v524_v46, %v424_v40 }
 0x100   : > { %534 = vst [vmem:[%s376_s30 + $0x8] sm:$0xff] %v513_v47  ;;  %538 = vst [vmem:[%s376_s30 + $0x28] sm:$0xff] %v525_v48 }
 0x101   : > { %v516_v50 = vpop.f32.mrf.mxu0  ;;  %v528_v51 = vpop.f32.mrf.mxu1 }
 0x102   : > { %v517_v52 = vadd.f32 %v516_v50, %v419_v39  ;;  %v529_v53 = vadd.f32 %v528_v51, %v429_v49 }
 0x103   : > { %v518_v54 = vpop.f32.mrf.mxu0  ;;  %v530_v55 = vpop.f32.mrf.mxu1 }
 0x104   : > { %535 = vst [vmem:[%s376_s30 + $0x10] sm:$0xff] %v517_v52  ;;  %539 = vst [vmem:[%s376_s30 + $0x30] sm:$0xff] %v529_v53  ;;  %v519_v56 = vadd.f32 %v518_v54, %v419_v39  ;;  %v531_v57 = vadd.f32 %v530_v55, %v429_v49 }
 0x106   : > { %536 = vst [vmem:[%s376_s30 + $0x18] sm:$0xff] %v519_v56  ;;  %540 = vst [vmem:[%s376_s30 + $0x38] sm:$0xff] %v531_v57 }
 0x107   : > { %v647_v59 = vpop.f32.mrf.mxu1  ;;  %v784_v60 = vpop.f32.mrf.mxu0 }
 0x108   : > { %1199 = shalt.err (!%p1196_p6)
}
 0x109   : > { %s1200_s25 = scalar_lea.hbm %s1599_s12, 1024  ;;  %s1204_s29 = scalar_lea.hbm %s1758_s7, 2048 }
 0x10a   : > { %p1201_p7 = scmp.ne.s32.totalorder %s1599_s12, %s1200_s25  ;;  %p1205_p13 = scmp.lt.s32.totalorder %s1599_s12, %s1758_s7 }
 0x10b   : > { %p1206_p2 = scmp.lt.s32.totalorder %s1204_s29, %s1200_s25 }
 0x10c   : > { %p1202_p10 = pnand %p1201_p7, %p1439_p9 }
 0x10d   : > { %p1207_p8 = por %p1206_p2, %p1205_p13 }
 0x10e   : > { %p1203_p4 = pneg %p1202_p10 }
 0x110   : > { %p1208_p12 = pnand %p1207_p8, %p1203_p4 }
 0x112   : > { %1211 = shalt.err (!%p1208_p12)
}
 0x113   : > { %s1765_s28 = smov 256   ;;  %s1331_s17 = smov 16   ;;  %v648_v61 = vadd.f32 %v647_v59, %v1581_v34  ;;  %v785_v62 = vadd.f32 %v784_v60, %v689_v58  ;;  %v649_v63 = vpop.f32.mrf.mxu1  ;;  %v786_v0 = vpop.f32.mrf.mxu0 }
 0x114   : > { %1080 = dma.vmem_to_hbm [thread:$0]  (%p1439_p9), %s1593_s16, 1024, %s1599_s12, %s816_s18, %s1765_s28, %s1765_s28, %s1331_s17   ;;  %v694_v1 = vpop.permute.xlu1 %693  ;;  %v650_v2 = vadd.f32 %v649_v63, %v1581_v34  ;;  %v787_v3 = vadd.f32 %v786_v0, %v689_v58  ;;  %v699_v10 = vpop.permute.xlu0 %698 }
 0x115   : > { %s1629_s19 = scalar_lea.vmem [#allocation6], %s1477_s23  ;;  %s1633_s25 = scalar_lea.vmem [#allocation8], %s1477_s23  ;;  %v653_v4 = vpop.f32.mrf.mxu1  ;;  %v790_v5 = vpop.f32.mrf.mxu0 }
 0x116   : > { %670 = vst [vmem:[%s1629_s19] sm:$0xff] %v648_v61  ;;  %807 = vst [vmem:[%s1633_s25] sm:$0xff] %v785_v62  ;;  %v654_v6 = vadd.f32 %v653_v4, %v1585_v36  ;;  %v791_v7 = vadd.f32 %v790_v5, %v694_v1  ;;  %s859_s13 = sshll.u32 %s1629_s19, 4  ;;  %s820_s23 = sand.u32 1, %s1415_s15   ;;  %s1655_s13 = int_to_ptr.vmem [resolvable:$true] %s859_s13 }
 0x117   : > { %671 = vst [vmem:[%s1629_s19 + $0x8] sm:$0xff] %v650_v2  ;;  %808 = vst [vmem:[%s1633_s25 + $0x8] sm:$0xff] %v787_v3  ;;  %v655_v8 = vpop.f32.mrf.mxu1  ;;  %v792_v9 = vpop.f32.mrf.mxu0  ;;  %s877_s16 = sshll.u32 %s1633_s25, 4  ;;  %s1664_s18 = scalar_lea.hbm %s1759_s8, %s1591_s21  ;;  %s1666_s16 = int_to_ptr.vmem [resolvable:$true] %s877_s16 }
 0x118   : > { %672 = vst [vmem:[%s1629_s19 + $0x10] sm:$0xff] %v654_v6  ;;  %809 = vst [vmem:[%s1633_s25 + $0x10] sm:$0xff] %v791_v7  ;;  %v656_v11 = vadd.f32 %v655_v8, %v1585_v36  ;;  %v793_v12 = vadd.f32 %v792_v9, %v694_v1  ;;  %v704_v19 = vpop.permute.xlu1 %703  ;;  %s1672_s29 = scalar_lea.hbm %s1760_s9, %s1591_s21  ;;  %s1676_s20 = scalar_lea.sflag [#allocation7], %s820_s23 }
 0x119   : > { %v659_v13 = vpop.f32.mrf.mxu1  ;;  %v796_v14 = vpop.f32.mrf.mxu0  ;;  %s1212_s26 = scalar_lea.vmem %s1655_s13, 1024  ;;  %s1332_s28 = smov [#allocation6]  }
 0x11a   : > { %673 = vst [vmem:[%s1629_s19 + $0x18] sm:$0xff] %v656_v11  ;;  %810 = vst [vmem:[%s1633_s25 + $0x18] sm:$0xff] %v793_v12  ;;  %v660_v15 = vadd.f32 %v659_v13, %v1583_v35  ;;  %v797_v16 = vadd.f32 %v796_v14, %v699_v10  ;;  %p1213_p0 = scmp.ne.s32.totalorder %s1655_s13, %s1212_s26  ;;  %s1216_s15 = sshll.u32 %s1332_s28, 4  ;;  %s1217_s15 = int_to_ptr.vmem [resolvable:$false] %s1216_s15 }
 0x11b   : > { %v661_v17 = vpop.f32.mrf.mxu1  ;;  %v798_v18 = vpop.f32.mrf.mxu0  ;;  %s1218_s12 = scalar_lea.vmem %s1217_s15, 2048  ;;  %p1219_p5 = scmp.lt.s32.totalorder %s1655_s13, %s1217_s15 }
 0x11c   : > { %674 = vst [vmem:[%s1629_s19 + $0x20] sm:$0xff] %v660_v15  ;;  %811 = vst [vmem:[%s1633_s25 + $0x20] sm:$0xff] %v797_v16  ;;  %v662_v20 = vadd.f32 %v661_v17, %v1583_v35  ;;  %v799_v21 = vadd.f32 %v798_v18, %v699_v10  ;;  %p1214_p1 = pnand %p1213_p0, %p1439_p9  ;;  %p1220_p6 = scmp.lt.s32.totalorder %s1218_s12, %s1212_s26 }
 0x11d   : > { %v665_v22 = vpop.f32.mrf.mxu1  ;;  %v802_v23 = vpop.f32.mrf.mxu0 }
 0x11e   : > { %675 = vst [vmem:[%s1629_s19 + $0x28] sm:$0xff] %v662_v20  ;;  %812 = vst [vmem:[%s1633_s25 + $0x28] sm:$0xff] %v799_v21  ;;  %v666_v24 = vadd.f32 %v665_v22, %v1587_v37  ;;  %v803_v25 = vadd.f32 %v802_v23, %v704_v19  ;;  %p1215_p3 = pneg %p1214_p1  ;;  %p1221_p7 = por %p1220_p6, %p1219_p5 }
 0x11f   : > { %v667_v26 = vpop.f32.mrf.mxu1  ;;  %v804_v27 = vpop.f32.mrf.mxu0 }
 0x120   : > { %676 = vst [vmem:[%s1629_s19 + $0x30] sm:$0xff] %v666_v24  ;;  %813 = vst [vmem:[%s1633_s25 + $0x30] sm:$0xff] %v803_v25  ;;  %v668_v28 = vadd.f32 %v667_v26, %v1587_v37  ;;  %v805_v29 = vadd.f32 %v804_v27, %v704_v19  ;;  %p1222_p10 = pnand %p1221_p7, %p1215_p3 }
 0x122   : > { %677 = vst [vmem:[%s1629_s19 + $0x38] sm:$0xff] %v668_v28  ;;  %814 = vst [vmem:[%s1633_s25 + $0x38] sm:$0xff] %v805_v29 }
 0x123   : > { %1225 = shalt.err (!%p1222_p10)
}
 0x124   : > { %s1226_s21 = scalar_lea.hbm %s1664_s18, 1024  ;;  %s1230_s28 = scalar_lea.hbm %s1759_s8, 2048 }
 0x125   : > { %p1227_p4 = scmp.ne.s32.totalorder %s1664_s18, %s1226_s21  ;;  %p1231_p8 = scmp.lt.s32.totalorder %s1664_s18, %s1759_s8 }
 0x126   : > { %p1232_p12 = scmp.lt.s32.totalorder %s1230_s28, %s1226_s21 }
 0x127   : > { %p1228_p13 = pnand %p1227_p4, %p1439_p9 }
 0x128   : > { %p1233_p0 = por %p1232_p12, %p1231_p8 }
 0x129   : > { %p1229_p2 = pneg %p1228_p13 }
 0x12b   : > { %p1234_p1 = pnand %p1233_p0, %p1229_p2 }
 0x12d   : > { %1237 = shalt.err (!%p1234_p1)
}
 0x12e   : > { %s1776_s30 = smov 256   ;;  %s1238_s26 = scalar_lea.vmem %s1666_s16, 1024 }
 0x12f   : > { %1081 = dma.vmem_to_hbm [thread:$0]  (%p1439_p9), %s1655_s13, 1024, %s1664_s18, %s1676_s20, %s1776_s30, %s1776_s30, %s1331_s17  }
 0x130   : > { %p1239_p3 = scmp.ne.s32.totalorder %s1666_s16, %s1238_s26  ;;  %s1333_s15 = smov [#allocation8]  }
 0x131   : > { %s1242_s12 = sshll.u32 %s1333_s15, 4  ;;  %s1243_s12 = int_to_ptr.vmem [resolvable:$false] %s1242_s12 }
 0x132   : > { %p1240_p5 = pnand %p1239_p3, %p1439_p9  ;;  %s1244_s21 = scalar_lea.vmem %s1243_s12, 2048 }
 0x133   : > { %p1245_p7 = scmp.lt.s32.totalorder %s1666_s16, %s1243_s12  ;;  %p1246_p10 = scmp.lt.s32.totalorder %s1244_s21, %s1238_s26 }
 0x134   : > { %p1241_p6 = pneg %p1240_p5 }
 0x135   : > { %p1247_p4 = por %p1246_p10, %p1245_p7 }
 0x137   : > { %p1248_p13 = pnand %p1247_p4, %p1241_p6 }
 0x139   : > { %1251 = shalt.err (!%p1248_p13)
}
 0x13a   : > { %s1252_s19 = scalar_lea.hbm %s1672_s29, 1024  ;;  %s1256_s25 = scalar_lea.hbm %s1760_s9, 2048 }
 0x13b   : > { %p1253_p2 = scmp.ne.s32.totalorder %s1672_s29, %s1252_s19  ;;  %p1257_p0 = scmp.lt.s32.totalorder %s1672_s29, %s1760_s9 }
 0x13c   : > { %p1258_p1 = scmp.lt.s32.totalorder %s1256_s25, %s1252_s19 }
 0x13d   : > { %p1254_p8 = pnand %p1253_p2, %p1439_p9 }
 0x13e   : > { %p1259_p3 = por %p1258_p1, %p1257_p0 }
 0x13f   : > { %p1255_p12 = pneg %p1254_p8 }
 0x141   : > { %p1260_p5 = pnand %p1259_p3, %p1255_p12 }
 0x143   : > { %1263 = shalt.err (!%p1260_p5)
}
 0x144   : > { %1082 = dma.vmem_to_hbm [thread:$0]  (%p1439_p9), %s1666_s16, 1024, %s1672_s29, %s1676_s20, %s1776_s30, %s1776_s30, %s1331_s17  }
 0x145 PF: > { %s1777_s27 = sld [smem:[#allocation12_spill]]  ;;  %p1778_p6 = scmp.ge.s32.totalorder %s1322_s14, 2 }
 0x147   : > { %p1091_p7 = pnand %p1778_p6, %p1448_p11 }
 0x149   : > { %p1092_p10 = pneg %p1091_p7 }
 0x14b   : > { %s892_s26 = sand.u32 1, %s1777_s27  }
 0x14c   : > { %s893_s15 = scalar_lea.sflag [#allocation4], %s892_s26 }
 0x14d   : > { %1293 = dma.done.wait (%p1092_p10), %s893_s15, 1024  }
 0x14e   : > { %1295 = vsyncadd (%p1092_p10), %s893_s15, 4294966272  ;;  %s1779_s22 = sadd.s32 4294967294, %s1322_s14  }
 0x14f   : > { %s901_s12 = sand.u32 1, %s1779_s22  }
 0x150   : > { %s902_s21 = scalar_lea.sflag [#allocation7], %s901_s12 }
 0x151   : > { %1297 = dma.done.wait (%p1092_p10), %s902_s21, 2048  }
 0x152   : > { %1299 = vsyncadd (%p1092_p10), %s902_s21, 4294965248  ;;  %s29_s14 = sadd.s32 1, %s1322_s14   ;;  %s1780_s17 = sld [smem:[#allocation15_spill]] }
 0x153   : > { %p26_p9 = scmp.ge.s32.totalorder %s29_s14, 4   ;;  %s1781_s12 = sld [smem:[#allocation13_spill]] }
 0x154   : > { %s1782_s13 = sld [smem:[#allocation14_spill]]  ;;  %s1783_s30 = smov %s1306_s10 }
 0x155   : > { %s1784_s10 = smov %s1310_s11  ;;  %28 = sbr.rel (!%p26_p9) target bundleno = 8 (0x8), region = 125 }
 0x158   : > { %s1785_s11 = smov %s1780_s17 }
 0x15a   :  { %916 = vsyncpa [#allocation3], 1 }
 0x15b   :  { %918 = vsyncpa [#allocation3 + $0x1], 1 }
 0x15c   :  { %919 = vsyncpa [#allocation4], 1 }
 0x15d   :  { %921 = vsyncpa [#allocation4 + $0x1], 1 }
 0x15e   :  { %922 = vsyncpa [#allocation7], 1 }
 0x15f   :  { %924 = vsyncpa [#allocation7 + $0x1], 1 }

</bundles_post_ra>
